<compile_context>
chip_gen: v5e
topology: v5e:2x2
jax: 0.10.0
libtpu: 0.0.40
codegen_flags: <defaults>
</compile_context>

<pallas_src>
import jax
import jax.numpy as jnp
from jax.experimental import pallas as pl
from jax.experimental.pallas import tpu as pltpu

INPUT_SIZE = 256
LANE = 128
NUM_CLASSES = 4

# MXU-operand dtype.  v5e/v6e/v7x MXUs are bf16-native; f32 operands are
# pass-decomposed.  Gate math and accumulation stay f32 regardless.
MATMUL_DTYPE = jnp.bfloat16


def _round_up(x, m):
    return ((x + m - 1) // m) * m


def _gate_stride(hidden_size):
    # Per-gate lane stride.  For 4*H <= 128 all four gates share one 128-lane
    # block (stride = H); otherwise each gate gets its own 128-aligned block.
    if 4 * hidden_size <= LANE:
        return hidden_size
    return _round_up(hidden_size, LANE)


def _lstm_kernel(x_ref, h0_ref, c0_ref, w_ih_ref, w_hh_ref, b_ref,
                 w_out_ref, b_out_ref, out_ref):
    TB = x_ref.shape[0]
    B, GS = h0_ref.shape            # GS = per-gate lane stride == state width
    T = TB // B

    # (1) Hoisted input projection for every timestep at once:
    #     one (T*B, 256) @ (256, 4*GS) MXU matmul, bf16 operands, f32 accum.
    xg = (jnp.dot(x_ref[...], w_ih_ref[...],
                  preferred_element_type=jnp.float32)
          + b_ref[...])                                   # (T*B, 4*GS) f32

    # Lane mask picking the tanh gate (g, lanes [2*GS, 3*GS)); built once,
    # not per step.
    lane = jax.lax.broadcasted_iota(jnp.int32, (B, 4 * GS), 1)
    g_mask = (lane >= 2 * GS) & (lane < 3 * GS)

    # (2) Serial recurrence as a static Python loop (T is small and static):
    #     only h @ W_hh sits on the critical path.  W_hh stays in VMEM and is
    #     streamed into the MXU each step (no vreg pinning / spill).
    # TODO(synk): for larger H, hold W_hh in MXU staging registers across the
    #   T steps via pltpu.matmul_push_rhs / matmul_acc_lhs / matmul_pop (and on
    #   v7x accumulate xg[t] in-place in the MRB instead of a VPU add).
    h = h0_ref[...]
    c = c0_ref[...]
    hs = []
    for t in range(T):
        gates = (xg[t * B:(t + 1) * B, :]
                 + jnp.dot(h.astype(w_hh_ref.dtype), w_hh_ref[...],
                           preferred_element_type=jnp.float32))
        # Two EUP passes over the whole gate block:
        #   sigmoid(x) = 0.5 * tanh(0.5 * x) + 0.5   (single-EUP-op form)
        sig = 0.5 * jnp.tanh(0.5 * gates) + 0.5
        th = jnp.tanh(gates)
        act = jnp.where(g_mask, th, sig)   # [ i_sig | f_sig | g_tanh | o_sig ]
        # Static lane slices (same XLU lane-rotate cost as pltpu.roll).
        i_g = act[:, 0 * GS:1 * GS]
        f_g = act[:, 1 * GS:2 * GS]
        g_g = act[:, 2 * GS:3 * GS]
        o_g = act[:, 3 * GS:4 * GS]
        c = f_g * c + i_g * g_g
        h = o_g * jnp.tanh(c)
        hs.append(h)

    # (3) Hoisted, lane-dense output projection: one (T*B, GS) @ (GS, 128)
    #     matmul and a single unmasked store (only cols [0, 4) are real).
    h_all = jnp.concatenate(hs, axis=0)                   # (T*B, GS), values
    out_ref[...] = (jnp.dot(h_all.astype(w_out_ref.dtype), w_out_ref[...],
                            preferred_element_type=jnp.float32)
                    + b_out_ref[...]).astype(out_ref.dtype)


def simple_lstm_forward(x_btf, kparams):
    """x_btf: (B, T, 256) batch-first, like the PyTorch module's input.

    Returns (T, B, 4): the module permutes to time-major before the LSTM, so
    its `predictions` are time-major.
    """
    B, T, F = x_btf.shape
    assert F == INPUT_SIZE

    # batch-first -> time-major, flattened to (T*B, F); bf16 MXU operand.
    x_flat = (jnp.transpose(x_btf, (1, 0, 2))
              .reshape(T * B, F)
              .astype(kparams["w_ih"].dtype))

    vmem = pl.BlockSpec(memory_space=pltpu.MemorySpace.VMEM)
    out_pad = pl.pallas_call(
        _lstm_kernel,
        out_shape=jax.ShapeDtypeStruct((T * B, LANE), jnp.float32),
        in_specs=[vmem] * 8,
        out_specs=vmem,
        # Explicit VMEM budget (demo uses <1 MiB; 16 MiB leaves double-buffer
        # headroom and stays well inside v7x's 64 MiB physical VMEM).
        compiler_params=pltpu.CompilerParams(vmem_limit_bytes=16 * 1024 * 1024),
        # TODO(synk): if T or H are scaled up, chunk the time axis (per-chunk
        #   input projection via pltpu.emit_pipeline, DMA h chunks out) instead
        #   of whole-sequence residency; for multiple independent sequences add
        #   a leading "parallel" grid axis to use both v7x TensorCores.
    )(x_flat, kparams["h0"], kparams["c0"], kparams["w_ih"], kparams["w_hh"],
      kparams["b"], kparams["w_out"], kparams["b_out"])

    return out_pad[:, :NUM_CLASSES].reshape(T, B, NUM_CLASSES)


# ---------------------------------------------------------------------------
# Parameter construction (PyTorch layout) + repacking for the kernel
# ---------------------------------------------------------------------------

def init_torch_params(key, hidden_size):
    """Deterministic synthetic parameters with PyTorch shapes."""
    H = hidden_size
    k = jax.random.split(key, 8)
    s = 1.0 / jnp.sqrt(H)
    return {
        "w_ih": jax.random.uniform(k[0], (4 * H, INPUT_SIZE), jnp.float32, -s, s),
        "w_hh": jax.random.uniform(k[1], (4 * H, H), jnp.float32, -s, s),
        "b_ih": jax.random.uniform(k[2], (4 * H,), jnp.float32, -s, s),
        "b_hh": jax.random.uniform(k[3], (4 * H,), jnp.float32, -s, s),
        "w_out": jax.random.uniform(k[4], (NUM_CLASSES, H), jnp.float32, -s, s),
        "b_out": jax.random.uniform(k[5], (NUM_CLASSES,), jnp.float32, -s, s),
        "h0": jax.random.normal(k[6], (1, 1, H), jnp.float32),
        "c0": jax.random.normal(k[7], (1, 1, H), jnp.float32),
    }


def prepare_kernel_params(tp, batch, matmul_dtype=MATMUL_DTYPE):
    """Repack PyTorch-layout params for the kernel.

    Gate layout: gate g (order i, f, g, o) occupies lanes [g*GS, g*GS + H) of a
    4*GS-wide block.  For 4*H <= 128 (GS == H) all four gates share one
    128-lane block; otherwise GS = round_up(H, 128) and the padded lanes are
    provably zero through the recurrence (zero weight rows/cols + zero bias +
    zero-padded h0/c0 keep padded gate preacts at 0, and zero W_hh / W_out rows
    prevent any leak into real lanes).
    """
    H = tp["w_hh"].shape[1]
    GS = _gate_stride(H)

    w_ih_t = tp["w_ih"].T            # (256, 4H), gate order i, f, g, o
    w_hh_t = tp["w_hh"].T            # (H, 4H)
    b = tp["b_ih"] + tp["b_hh"]      # (4H,)

    w_ih_p = jnp.zeros((INPUT_SIZE, 4 * GS), jnp.float32)
    w_hh_p = jnp.zeros((GS, 4 * GS), jnp.float32)
    b_p = jnp.zeros((1, 4 * GS), jnp.float32)
    for g in range(4):
        w_ih_p = w_ih_p.at[:, g * GS:g * GS + H].set(w_ih_t[:, g * H:(g + 1) * H])
        w_hh_p = w_hh_p.at[:H, g * GS:g * GS + H].set(w_hh_t[:, g * H:(g + 1) * H])
        b_p = b_p.at[0, g * GS:g * GS + H].set(b[g * H:(g + 1) * H])

    # Lane-dense output projection: pad the 4 output columns to 128.
    w_out_p = (jnp.zeros((GS, LANE), jnp.float32)
               .at[:H, :NUM_CLASSES].set(tp["w_out"].T))
    b_out_p = jnp.zeros((1, LANE), jnp.float32).at[0, :NUM_CLASSES].set(tp["b_out"])

    h0_p = jnp.zeros((batch, GS), jnp.float32).at[:, :H].set(
        jnp.broadcast_to(tp["h0"][0], (batch, H)))
    c0_p = jnp.zeros((batch, GS), jnp.float32).at[:, :H].set(
        jnp.broadcast_to(tp["c0"][0], (batch, H)))

    return {
        "w_ih": w_ih_p.astype(matmul_dtype),
        "w_hh": w_hh_p.astype(matmul_dtype),
        "w_out": w_out_p.astype(matmul_dtype),
        "b": b_p, "b_out": b_out_p,      # biases stay f32 (added post-MXU)
        "h0": h0_p, "c0": c0_p,          # state stays f32
    }


def lstm_reference(x_btf, tp):
    """Pure-JAX f32 reference of the PyTorch forward (unpadded weights)."""
    H = tp["w_hh"].shape[1]
    B = x_btf.shape[0]
    x_tm = jnp.transpose(x_btf, (1, 0, 2)).astype(jnp.float32)
    w_ih, w_hh = tp["w_ih"].T, tp["w_hh"].T
    b = (tp["b_ih"] + tp["b_hh"]).reshape(1, -1)
    w_out, b_out = tp["w_out"].T, tp["b_out"].reshape(1, -1)
    h0 = jnp.broadcast_to(tp["h0"][0], (B, H))
    c0 = jnp.broadcast_to(tp["c0"][0], (B, H))

    def step(carry, x_t):
        h, c = carry
        gates = x_t @ w_ih + h @ w_hh + b
        i_g = jax.nn.sigmoid(gates[:, 0 * H:1 * H])
        f_g = jax.nn.sigmoid(gates[:, 1 * H:2 * H])
        g_g = jnp.tanh(gates[:, 2 * H:3 * H])
        o_g = jax.nn.sigmoid(gates[:, 3 * H:4 * H])
        c_new = f_g * c + i_g * g_g
        h_new = o_g * jnp.tanh(c_new)
        return (h_new, c_new), h_new @ w_out + b_out

    _, outs = jax.lax.scan(step, (h0, c0), x_tm)
    return outs   # (T, B, 4)


if __name__ == "__main__":
    HIDDEN = 32
    BATCH = 1      # the PyTorch module's (1, 1, H) h0/c0 implies batch == 1
    SEQ = 8

    key = jax.random.PRNGKey(0)
    k_x, k_p = jax.random.split(key)
    x = jax.random.normal(k_x, (BATCH, SEQ, INPUT_SIZE), jnp.float32)

    tparams = init_torch_params(k_p, HIDDEN)
    kparams = prepare_kernel_params(tparams, BATCH)

    out = jax.block_until_ready(simple_lstm_forward(x, kparams))
    ref = jax.block_until_ready(lstm_reference(x, tparams))

    assert out.shape == (SEQ, BATCH, NUM_CLASSES)
    max_diff = float(jnp.max(jnp.abs(out - ref)))
    # bf16 MXU operands (f32 accumulate / f32 gate math) vs. an f32 reference;
    # the pure-f32 path (MATMUL_DTYPE = jnp.float32) reproduces it to < 1e-4.
    tol = 1e-4 if MATMUL_DTYPE == jnp.float32 else 5e-2
    assert max_diff < tol, f"max abs diff {max_diff}"

    print("KERNEL_OK")
</pallas_src>

<mosaic_0001>
module attributes {stable_mosaic.version = 11 : i64} {
  func.func @_lstm_kernel(%arg0: memref<8x256xbf16, #tpu.memory_space<vmem>>, %arg1: memref<1x32xf32, #tpu.memory_space<vmem>>, %arg2: memref<1x32xf32, #tpu.memory_space<vmem>>, %arg3: memref<256x128xbf16, #tpu.memory_space<vmem>>, %arg4: memref<32x128xbf16, #tpu.memory_space<vmem>>, %arg5: memref<1x128xf32, #tpu.memory_space<vmem>>, %arg6: memref<32x128xbf16, #tpu.memory_space<vmem>>, %arg7: memref<1x128xf32, #tpu.memory_space<vmem>>, %arg8: memref<8x128xf32, #tpu.memory_space<vmem>>) attributes {dimension_semantics = [], scalar_prefetch = 0 : i64, scratch_operands = 0 : i64, tpu.core_type = #tpu.core_type<tc>} {
    %c0 = arith.constant 0 : index
    %c0_0 = arith.constant 0 : index
    %0 = vector.load %arg0[%c0, %c0_0] : memref<8x256xbf16, #tpu.memory_space<vmem>>, vector<8x256xbf16>
    %c0_1 = arith.constant 0 : index
    %c0_2 = arith.constant 0 : index
    %1 = vector.load %arg3[%c0_1, %c0_2] : memref<256x128xbf16, #tpu.memory_space<vmem>>, vector<256x128xbf16>
    %cst = arith.constant dense<0.000000e+00> : vector<8x128xf32>
    %2 = tpu.matmul %0, %1, %cst {dimension_numbers = #tpu.dot_dimension_numbers<[1], [0], [0], [1], [0, 0, 1, 1], [], []>} : vector<8x256xbf16>, vector<256x128xbf16>, vector<8x128xf32> -> vector<8x128xf32>
    %c0_3 = arith.constant 0 : index
    %c0_4 = arith.constant 0 : index
    %3 = vector.load %arg5[%c0_3, %c0_4] : memref<1x128xf32, #tpu.memory_space<vmem>>, vector<1x128xf32>
    %4 = vector.broadcast %3 : vector<1x128xf32> to vector<8x128xf32>
    %5 = arith.addf %2, %4 : vector<8x128xf32>
    %6 = tpu.iota {dimensions = array<i32: 1>} : vector<1x128xi32>
    %c64_i32 = arith.constant 64 : i32
    %7 = vector.broadcast %c64_i32 : i32 to vector<1x128xi32>
    %8 = arith.cmpi sge, %6, %7 : vector<1x128xi32>
    %c96_i32 = arith.constant 96 : i32
    %9 = vector.broadcast %c96_i32 : i32 to vector<1x128xi32>
    %10 = arith.cmpi slt, %6, %9 : vector<1x128xi32>
    %11 = arith.andi %8, %10 : vector<1x128xi1>
    %c0_5 = arith.constant 0 : index
    %c0_6 = arith.constant 0 : index
    %12 = vector.load %arg1[%c0_5, %c0_6] : memref<1x32xf32, #tpu.memory_space<vmem>>, vector<1x32xf32>
    %c0_7 = arith.constant 0 : index
    %c0_8 = arith.constant 0 : index
    %13 = vector.load %arg2[%c0_7, %c0_8] : memref<1x32xf32, #tpu.memory_space<vmem>>, vector<1x32xf32>
    %14 = vector.extract_strided_slice %5 {offsets = [0, 0], sizes = [1, 128], strides = [1, 1]} : vector<8x128xf32> to vector<1x128xf32>
    %15 = arith.truncf %12 : vector<1x32xf32> to vector<1x32xbf16>
    %c0_9 = arith.constant 0 : index
    %c0_10 = arith.constant 0 : index
    %16 = vector.load %arg4[%c0_9, %c0_10] : memref<32x128xbf16, #tpu.memory_space<vmem>>, vector<32x128xbf16>
    %cst_11 = arith.constant dense<0.000000e+00> : vector<1x128xf32>
    %17 = tpu.matmul %15, %16, %cst_11 {dimension_numbers = #tpu.dot_dimension_numbers<[1], [0], [0], [1], [0, 0, 1, 1], [], []>} : vector<1x32xbf16>, vector<32x128xbf16>, vector<1x128xf32> -> vector<1x128xf32>
    %18 = arith.addf %14, %17 : vector<1x128xf32>
    %cst_12 = arith.constant 5.000000e-01 : f32
    %19 = vector.broadcast %cst_12 : f32 to vector<1x128xf32>
    %20 = arith.mulf %19, %18 : vector<1x128xf32>
    %21 = math.tanh %20 : vector<1x128xf32>
    %cst_13 = arith.constant 5.000000e-01 : f32
    %22 = vector.broadcast %cst_13 : f32 to vector<1x128xf32>
    %23 = arith.mulf %22, %21 : vector<1x128xf32>
    %cst_14 = arith.constant 5.000000e-01 : f32
    %24 = vector.broadcast %cst_14 : f32 to vector<1x128xf32>
    %25 = arith.addf %23, %24 : vector<1x128xf32>
    %26 = math.tanh %18 : vector<1x128xf32>
    %27 = arith.select %11, %26, %25 : vector<1x128xi1>, vector<1x128xf32>
    %28 = vector.extract_strided_slice %27 {offsets = [0, 0], sizes = [1, 32], strides = [1, 1]} : vector<1x128xf32> to vector<1x32xf32>
    %29 = vector.extract_strided_slice %27 {offsets = [0, 32], sizes = [1, 32], strides = [1, 1]} : vector<1x128xf32> to vector<1x32xf32>
    %30 = vector.extract_strided_slice %27 {offsets = [0, 64], sizes = [1, 32], strides = [1, 1]} : vector<1x128xf32> to vector<1x32xf32>
    %31 = vector.extract_strided_slice %27 {offsets = [0, 96], sizes = [1, 32], strides = [1, 1]} : vector<1x128xf32> to vector<1x32xf32>
    %32 = arith.mulf %29, %13 : vector<1x32xf32>
    %33 = arith.mulf %28, %30 : vector<1x32xf32>
    %34 = arith.addf %32, %33 : vector<1x32xf32>
    %35 = math.tanh %34 : vector<1x32xf32>
    %36 = arith.mulf %31, %35 : vector<1x32xf32>
    %37 = vector.extract_strided_slice %5 {offsets = [1, 0], sizes = [1, 128], strides = [1, 1]} : vector<8x128xf32> to vector<1x128xf32>
    %38 = arith.truncf %36 : vector<1x32xf32> to vector<1x32xbf16>
    %c0_15 = arith.constant 0 : index
    %c0_16 = arith.constant 0 : index
    %39 = vector.load %arg4[%c0_15, %c0_16] : memref<32x128xbf16, #tpu.memory_space<vmem>>, vector<32x128xbf16>
    %cst_17 = arith.constant dense<0.000000e+00> : vector<1x128xf32>
    %40 = tpu.matmul %38, %39, %cst_17 {dimension_numbers = #tpu.dot_dimension_numbers<[1], [0], [0], [1], [0, 0, 1, 1], [], []>} : vector<1x32xbf16>, vector<32x128xbf16>, vector<1x128xf32> -> vector<1x128xf32>
    %41 = arith.addf %37, %40 : vector<1x128xf32>
    %cst_18 = arith.constant 5.000000e-01 : f32
    %42 = vector.broadcast %cst_18 : f32 to vector<1x128xf32>
    %43 = arith.mulf %42, %41 : vector<1x128xf32>
    %44 = math.tanh %43 : vector<1x128xf32>
    %cst_19 = arith.constant 5.000000e-01 : f32
    %45 = vector.broadcast %cst_19 : f32 to vector<1x128xf32>
    %46 = arith.mulf %45, %44 : vector<1x128xf32>
    %cst_20 = arith.constant 5.000000e-01 : f32
    %47 = vector.broadcast %cst_20 : f32 to vector<1x128xf32>
    %48 = arith.addf %46, %47 : vector<1x128xf32>
    %49 = math.tanh %41 : vector<1x128xf32>
    %50 = arith.select %11, %49, %48 : vector<1x128xi1>, vector<1x128xf32>
    %51 = vector.extract_strided_slice %50 {offsets = [0, 0], sizes = [1, 32], strides = [1, 1]} : vector<1x128xf32> to vector<1x32xf32>
    %52 = vector.extract_strided_slice %50 {offsets = [0, 32], sizes = [1, 32], strides = [1, 1]} : vector<1x128xf32> to vector<1x32xf32>
    %53 = vector.extract_strided_slice %50 {offsets = [0, 64], sizes = [1, 32], strides = [1, 1]} : vector<1x128xf32> to vector<1x32xf32>
    %54 = vector.extract_strided_slice %50 {offsets = [0, 96], sizes = [1, 32], strides = [1, 1]} : vector<1x128xf32> to vector<1x32xf32>
    %55 = arith.mulf %52, %34 : vector<1x32xf32>
    %56 = arith.mulf %51, %53 : vector<1x32xf32>
    %57 = arith.addf %55, %56 : vector<1x32xf32>
    %58 = math.tanh %57 : vector<1x32xf32>
    %59 = arith.mulf %54, %58 : vector<1x32xf32>
    %60 = vector.extract_strided_slice %5 {offsets = [2, 0], sizes = [1, 128], strides = [1, 1]} : vector<8x128xf32> to vector<1x128xf32>
    %61 = arith.truncf %59 : vector<1x32xf32> to vector<1x32xbf16>
    %c0_21 = arith.constant 0 : index
    %c0_22 = arith.constant 0 : index
    %62 = vector.load %arg4[%c0_21, %c0_22] : memref<32x128xbf16, #tpu.memory_space<vmem>>, vector<32x128xbf16>
    %cst_23 = arith.constant dense<0.000000e+00> : vector<1x128xf32>
    %63 = tpu.matmul %61, %62, %cst_23 {dimension_numbers = #tpu.dot_dimension_numbers<[1], [0], [0], [1], [0, 0, 1, 1], [], []>} : vector<1x32xbf16>, vector<32x128xbf16>, vector<1x128xf32> -> vector<1x128xf32>
    %64 = arith.addf %60, %63 : vector<1x128xf32>
    %cst_24 = arith.constant 5.000000e-01 : f32
    %65 = vector.broadcast %cst_24 : f32 to vector<1x128xf32>
    %66 = arith.mulf %65, %64 : vector<1x128xf32>
    %67 = math.tanh %66 : vector<1x128xf32>
    %cst_25 = arith.constant 5.000000e-01 : f32
    %68 = vector.broadcast %cst_25 : f32 to vector<1x128xf32>
    %69 = arith.mulf %68, %67 : vector<1x128xf32>
    %cst_26 = arith.constant 5.000000e-01 : f32
    %70 = vector.broadcast %cst_26 : f32 to vector<1x128xf32>
    %71 = arith.addf %69, %70 : vector<1x128xf32>
    %72 = math.tanh %64 : vector<1x128xf32>
    %73 = arith.select %11, %72, %71 : vector<1x128xi1>, vector<1x128xf32>
    %74 = vector.extract_strided_slice %73 {offsets = [0, 0], sizes = [1, 32], strides = [1, 1]} : vector<1x128xf32> to vector<1x32xf32>
    %75 = vector.extract_strided_slice %73 {offsets = [0, 32], sizes = [1, 32], strides = [1, 1]} : vector<1x128xf32> to vector<1x32xf32>
    %76 = vector.extract_strided_slice %73 {offsets = [0, 64], sizes = [1, 32], strides = [1, 1]} : vector<1x128xf32> to vector<1x32xf32>
    %77 = vector.extract_strided_slice %73 {offsets = [0, 96], sizes = [1, 32], strides = [1, 1]} : vector<1x128xf32> to vector<1x32xf32>
    %78 = arith.mulf %75, %57 : vector<1x32xf32>
    %79 = arith.mulf %74, %76 : vector<1x32xf32>
    %80 = arith.addf %78, %79 : vector<1x32xf32>
    %81 = math.tanh %80 : vector<1x32xf32>
    %82 = arith.mulf %77, %81 : vector<1x32xf32>
    %83 = vector.extract_strided_slice %5 {offsets = [3, 0], sizes = [1, 128], strides = [1, 1]} : vector<8x128xf32> to vector<1x128xf32>
    %84 = arith.truncf %82 : vector<1x32xf32> to vector<1x32xbf16>
    %c0_27 = arith.constant 0 : index
    %c0_28 = arith.constant 0 : index
    %85 = vector.load %arg4[%c0_27, %c0_28] : memref<32x128xbf16, #tpu.memory_space<vmem>>, vector<32x128xbf16>
    %cst_29 = arith.constant dense<0.000000e+00> : vector<1x128xf32>
    %86 = tpu.matmul %84, %85, %cst_29 {dimension_numbers = #tpu.dot_dimension_numbers<[1], [0], [0], [1], [0, 0, 1, 1], [], []>} : vector<1x32xbf16>, vector<32x128xbf16>, vector<1x128xf32> -> vector<1x128xf32>
    %87 = arith.addf %83, %86 : vector<1x128xf32>
    %cst_30 = arith.constant 5.000000e-01 : f32
    %88 = vector.broadcast %cst_30 : f32 to vector<1x128xf32>
    %89 = arith.mulf %88, %87 : vector<1x128xf32>
    %90 = math.tanh %89 : vector<1x128xf32>
    %cst_31 = arith.constant 5.000000e-01 : f32
    %91 = vector.broadcast %cst_31 : f32 to vector<1x128xf32>
    %92 = arith.mulf %91, %90 : vector<1x128xf32>
    %cst_32 = arith.constant 5.000000e-01 : f32
    %93 = vector.broadcast %cst_32 : f32 to vector<1x128xf32>
    %94 = arith.addf %92, %93 : vector<1x128xf32>
    %95 = math.tanh %87 : vector<1x128xf32>
    %96 = arith.select %11, %95, %94 : vector<1x128xi1>, vector<1x128xf32>
    %97 = vector.extract_strided_slice %96 {offsets = [0, 0], sizes = [1, 32], strides = [1, 1]} : vector<1x128xf32> to vector<1x32xf32>
    %98 = vector.extract_strided_slice %96 {offsets = [0, 32], sizes = [1, 32], strides = [1, 1]} : vector<1x128xf32> to vector<1x32xf32>
    %99 = vector.extract_strided_slice %96 {offsets = [0, 64], sizes = [1, 32], strides = [1, 1]} : vector<1x128xf32> to vector<1x32xf32>
    %100 = vector.extract_strided_slice %96 {offsets = [0, 96], sizes = [1, 32], strides = [1, 1]} : vector<1x128xf32> to vector<1x32xf32>
    %101 = arith.mulf %98, %80 : vector<1x32xf32>
    %102 = arith.mulf %97, %99 : vector<1x32xf32>
    %103 = arith.addf %101, %102 : vector<1x32xf32>
    %104 = math.tanh %103 : vector<1x32xf32>
    %105 = arith.mulf %100, %104 : vector<1x32xf32>
    %106 = vector.extract_strided_slice %5 {offsets = [4, 0], sizes = [1, 128], strides = [1, 1]} : vector<8x128xf32> to vector<1x128xf32>
    %107 = arith.truncf %105 : vector<1x32xf32> to vector<1x32xbf16>
    %c0_33 = arith.constant 0 : index
    %c0_34 = arith.constant 0 : index
    %108 = vector.load %arg4[%c0_33, %c0_34] : memref<32x128xbf16, #tpu.memory_space<vmem>>, vector<32x128xbf16>
    %cst_35 = arith.constant dense<0.000000e+00> : vector<1x128xf32>
    %109 = tpu.matmul %107, %108, %cst_35 {dimension_numbers = #tpu.dot_dimension_numbers<[1], [0], [0], [1], [0, 0, 1, 1], [], []>} : vector<1x32xbf16>, vector<32x128xbf16>, vector<1x128xf32> -> vector<1x128xf32>
    %110 = arith.addf %106, %109 : vector<1x128xf32>
    %cst_36 = arith.constant 5.000000e-01 : f32
    %111 = vector.broadcast %cst_36 : f32 to vector<1x128xf32>
    %112 = arith.mulf %111, %110 : vector<1x128xf32>
    %113 = math.tanh %112 : vector<1x128xf32>
    %cst_37 = arith.constant 5.000000e-01 : f32
    %114 = vector.broadcast %cst_37 : f32 to vector<1x128xf32>
    %115 = arith.mulf %114, %113 : vector<1x128xf32>
    %cst_38 = arith.constant 5.000000e-01 : f32
    %116 = vector.broadcast %cst_38 : f32 to vector<1x128xf32>
    %117 = arith.addf %115, %116 : vector<1x128xf32>
    %118 = math.tanh %110 : vector<1x128xf32>
    %119 = arith.select %11, %118, %117 : vector<1x128xi1>, vector<1x128xf32>
    %120 = vector.extract_strided_slice %119 {offsets = [0, 0], sizes = [1, 32], strides = [1, 1]} : vector<1x128xf32> to vector<1x32xf32>
    %121 = vector.extract_strided_slice %119 {offsets = [0, 32], sizes = [1, 32], strides = [1, 1]} : vector<1x128xf32> to vector<1x32xf32>
    %122 = vector.extract_strided_slice %119 {offsets = [0, 64], sizes = [1, 32], strides = [1, 1]} : vector<1x128xf32> to vector<1x32xf32>
    %123 = vector.extract_strided_slice %119 {offsets = [0, 96], sizes = [1, 32], strides = [1, 1]} : vector<1x128xf32> to vector<1x32xf32>
    %124 = arith.mulf %121, %103 : vector<1x32xf32>
    %125 = arith.mulf %120, %122 : vector<1x32xf32>
    %126 = arith.addf %124, %125 : vector<1x32xf32>
    %127 = math.tanh %126 : vector<1x32xf32>
    %128 = arith.mulf %123, %127 : vector<1x32xf32>
    %129 = vector.extract_strided_slice %5 {offsets = [5, 0], sizes = [1, 128], strides = [1, 1]} : vector<8x128xf32> to vector<1x128xf32>
    %130 = arith.truncf %128 : vector<1x32xf32> to vector<1x32xbf16>
    %c0_39 = arith.constant 0 : index
    %c0_40 = arith.constant 0 : index
    %131 = vector.load %arg4[%c0_39, %c0_40] : memref<32x128xbf16, #tpu.memory_space<vmem>>, vector<32x128xbf16>
    %cst_41 = arith.constant dense<0.000000e+00> : vector<1x128xf32>
    %132 = tpu.matmul %130, %131, %cst_41 {dimension_numbers = #tpu.dot_dimension_numbers<[1], [0], [0], [1], [0, 0, 1, 1], [], []>} : vector<1x32xbf16>, vector<32x128xbf16>, vector<1x128xf32> -> vector<1x128xf32>
    %133 = arith.addf %129, %132 : vector<1x128xf32>
    %cst_42 = arith.constant 5.000000e-01 : f32
    %134 = vector.broadcast %cst_42 : f32 to vector<1x128xf32>
    %135 = arith.mulf %134, %133 : vector<1x128xf32>
    %136 = math.tanh %135 : vector<1x128xf32>
    %cst_43 = arith.constant 5.000000e-01 : f32
    %137 = vector.broadcast %cst_43 : f32 to vector<1x128xf32>
    %138 = arith.mulf %137, %136 : vector<1x128xf32>
    %cst_44 = arith.constant 5.000000e-01 : f32
    %139 = vector.broadcast %cst_44 : f32 to vector<1x128xf32>
    %140 = arith.addf %138, %139 : vector<1x128xf32>
    %141 = math.tanh %133 : vector<1x128xf32>
    %142 = arith.select %11, %141, %140 : vector<1x128xi1>, vector<1x128xf32>
    %143 = vector.extract_strided_slice %142 {offsets = [0, 0], sizes = [1, 32], strides = [1, 1]} : vector<1x128xf32> to vector<1x32xf32>
    %144 = vector.extract_strided_slice %142 {offsets = [0, 32], sizes = [1, 32], strides = [1, 1]} : vector<1x128xf32> to vector<1x32xf32>
    %145 = vector.extract_strided_slice %142 {offsets = [0, 64], sizes = [1, 32], strides = [1, 1]} : vector<1x128xf32> to vector<1x32xf32>
    %146 = vector.extract_strided_slice %142 {offsets = [0, 96], sizes = [1, 32], strides = [1, 1]} : vector<1x128xf32> to vector<1x32xf32>
    %147 = arith.mulf %144, %126 : vector<1x32xf32>
    %148 = arith.mulf %143, %145 : vector<1x32xf32>
    %149 = arith.addf %147, %148 : vector<1x32xf32>
    %150 = math.tanh %149 : vector<1x32xf32>
    %151 = arith.mulf %146, %150 : vector<1x32xf32>
    %152 = vector.extract_strided_slice %5 {offsets = [6, 0], sizes = [1, 128], strides = [1, 1]} : vector<8x128xf32> to vector<1x128xf32>
    %153 = arith.truncf %151 : vector<1x32xf32> to vector<1x32xbf16>
    %c0_45 = arith.constant 0 : index
    %c0_46 = arith.constant 0 : index
    %154 = vector.load %arg4[%c0_45, %c0_46] : memref<32x128xbf16, #tpu.memory_space<vmem>>, vector<32x128xbf16>
    %cst_47 = arith.constant dense<0.000000e+00> : vector<1x128xf32>
    %155 = tpu.matmul %153, %154, %cst_47 {dimension_numbers = #tpu.dot_dimension_numbers<[1], [0], [0], [1], [0, 0, 1, 1], [], []>} : vector<1x32xbf16>, vector<32x128xbf16>, vector<1x128xf32> -> vector<1x128xf32>
    %156 = arith.addf %152, %155 : vector<1x128xf32>
    %cst_48 = arith.constant 5.000000e-01 : f32
    %157 = vector.broadcast %cst_48 : f32 to vector<1x128xf32>
    %158 = arith.mulf %157, %156 : vector<1x128xf32>
    %159 = math.tanh %158 : vector<1x128xf32>
    %cst_49 = arith.constant 5.000000e-01 : f32
    %160 = vector.broadcast %cst_49 : f32 to vector<1x128xf32>
    %161 = arith.mulf %160, %159 : vector<1x128xf32>
    %cst_50 = arith.constant 5.000000e-01 : f32
    %162 = vector.broadcast %cst_50 : f32 to vector<1x128xf32>
    %163 = arith.addf %161, %162 : vector<1x128xf32>
    %164 = math.tanh %156 : vector<1x128xf32>
    %165 = arith.select %11, %164, %163 : vector<1x128xi1>, vector<1x128xf32>
    %166 = vector.extract_strided_slice %165 {offsets = [0, 0], sizes = [1, 32], strides = [1, 1]} : vector<1x128xf32> to vector<1x32xf32>
    %167 = vector.extract_strided_slice %165 {offsets = [0, 32], sizes = [1, 32], strides = [1, 1]} : vector<1x128xf32> to vector<1x32xf32>
    %168 = vector.extract_strided_slice %165 {offsets = [0, 64], sizes = [1, 32], strides = [1, 1]} : vector<1x128xf32> to vector<1x32xf32>
    %169 = vector.extract_strided_slice %165 {offsets = [0, 96], sizes = [1, 32], strides = [1, 1]} : vector<1x128xf32> to vector<1x32xf32>
    %170 = arith.mulf %167, %149 : vector<1x32xf32>
    %171 = arith.mulf %166, %168 : vector<1x32xf32>
    %172 = arith.addf %170, %171 : vector<1x32xf32>
    %173 = math.tanh %172 : vector<1x32xf32>
    %174 = arith.mulf %169, %173 : vector<1x32xf32>
    %175 = vector.extract_strided_slice %5 {offsets = [7, 0], sizes = [1, 128], strides = [1, 1]} : vector<8x128xf32> to vector<1x128xf32>
    %176 = arith.truncf %174 : vector<1x32xf32> to vector<1x32xbf16>
    %c0_51 = arith.constant 0 : index
    %c0_52 = arith.constant 0 : index
    %177 = vector.load %arg4[%c0_51, %c0_52] : memref<32x128xbf16, #tpu.memory_space<vmem>>, vector<32x128xbf16>
    %cst_53 = arith.constant dense<0.000000e+00> : vector<1x128xf32>
    %178 = tpu.matmul %176, %177, %cst_53 {dimension_numbers = #tpu.dot_dimension_numbers<[1], [0], [0], [1], [0, 0, 1, 1], [], []>} : vector<1x32xbf16>, vector<32x128xbf16>, vector<1x128xf32> -> vector<1x128xf32>
    %179 = arith.addf %175, %178 : vector<1x128xf32>
    %cst_54 = arith.constant 5.000000e-01 : f32
    %180 = vector.broadcast %cst_54 : f32 to vector<1x128xf32>
    %181 = arith.mulf %180, %179 : vector<1x128xf32>
    %182 = math.tanh %181 : vector<1x128xf32>
    %cst_55 = arith.constant 5.000000e-01 : f32
    %183 = vector.broadcast %cst_55 : f32 to vector<1x128xf32>
    %184 = arith.mulf %183, %182 : vector<1x128xf32>
    %cst_56 = arith.constant 5.000000e-01 : f32
    %185 = vector.broadcast %cst_56 : f32 to vector<1x128xf32>
    %186 = arith.addf %184, %185 : vector<1x128xf32>
    %187 = math.tanh %179 : vector<1x128xf32>
    %188 = arith.select %11, %187, %186 : vector<1x128xi1>, vector<1x128xf32>
    %189 = vector.extract_strided_slice %188 {offsets = [0, 0], sizes = [1, 32], strides = [1, 1]} : vector<1x128xf32> to vector<1x32xf32>
    %190 = vector.extract_strided_slice %188 {offsets = [0, 32], sizes = [1, 32], strides = [1, 1]} : vector<1x128xf32> to vector<1x32xf32>
    %191 = vector.extract_strided_slice %188 {offsets = [0, 64], sizes = [1, 32], strides = [1, 1]} : vector<1x128xf32> to vector<1x32xf32>
    %192 = vector.extract_strided_slice %188 {offsets = [0, 96], sizes = [1, 32], strides = [1, 1]} : vector<1x128xf32> to vector<1x32xf32>
    %193 = arith.mulf %190, %172 : vector<1x32xf32>
    %194 = arith.mulf %189, %191 : vector<1x32xf32>
    %195 = arith.addf %193, %194 : vector<1x32xf32>
    %196 = math.tanh %195 : vector<1x32xf32>
    %197 = arith.mulf %192, %196 : vector<1x32xf32>
    %198 = tpu.concatenate %36, %59, %82, %105, %128, %151, %174, %197 in 0 : vector<1x32xf32>, vector<1x32xf32>, vector<1x32xf32>, vector<1x32xf32>, vector<1x32xf32>, vector<1x32xf32>, vector<1x32xf32>, vector<1x32xf32> -> vector<8x32xf32>
    %199 = arith.truncf %198 : vector<8x32xf32> to vector<8x32xbf16>
    %c0_57 = arith.constant 0 : index
    %c0_58 = arith.constant 0 : index
    %200 = vector.load %arg6[%c0_57, %c0_58] : memref<32x128xbf16, #tpu.memory_space<vmem>>, vector<32x128xbf16>
    %cst_59 = arith.constant dense<0.000000e+00> : vector<8x128xf32>
    %201 = tpu.matmul %199, %200, %cst_59 {dimension_numbers = #tpu.dot_dimension_numbers<[1], [0], [0], [1], [0, 0, 1, 1], [], []>} : vector<8x32xbf16>, vector<32x128xbf16>, vector<8x128xf32> -> vector<8x128xf32>
    %c0_60 = arith.constant 0 : index
    %c0_61 = arith.constant 0 : index
    %202 = vector.load %arg7[%c0_60, %c0_61] : memref<1x128xf32, #tpu.memory_space<vmem>>, vector<1x128xf32>
    %203 = vector.broadcast %202 : vector<1x128xf32> to vector<8x128xf32>
    %204 = arith.addf %201, %203 : vector<8x128xf32>
    %c0_62 = arith.constant 0 : index
    %c0_63 = arith.constant 0 : index
    %205 = vector.load %arg8[%c0_62, %c0_63] : memref<8x128xf32, #tpu.memory_space<vmem>>, vector<8x128xf32>
    tpu.vector_store %arg8[%c0_62, %c0_63], %204 {strides = array<i32>} : memref<8x128xf32, #tpu.memory_space<vmem>>, vector<8x128xf32>,
    return
  }
}

</mosaic_0001>

<bundles_post_ra>
// kernel: tpu_custom_call.1
= control target key start
LH: loop header
LB: loop body
LE: loop exit
PB: predicated region body
PF: predicated region fallthrough
CT: control target
= control target key end

     0   :  { %13 = vsyncpa [#allocation3], 0  ;;  %s1281_s0 = inlined_call_operand.hbm [shape: bf16[8,256], index: 0, kind: input, shape index: {}]   ;;  %s1282_s1 = inlined_call_operand.hbm [shape: f32[1,32], index: 1, kind: input, shape index: {}]   ;;  %s1283_s2 = inlined_call_operand.vmem [shape: f32[1,32], index: 2, kind: input, shape index: {}]   ;;  %s1284_s3 = inlined_call_operand.hbm [shape: bf16[256,128], index: 3, kind: input, shape index: {}]   ;;  %s1285_s4 = inlined_call_operand.hbm [shape: bf16[32,128], index: 4, kind: input, shape index: {}]   ;;  %s1286_s5 = inlined_call_operand.vmem [shape: f32[1,128], index: 5, kind: input, shape index: {}]   ;;  %s1287_s6 = inlined_call_operand.hbm [shape: bf16[32,128], index: 6, kind: input, shape index: {}]   ;;  %s1288_s7 = inlined_call_operand.vmem [shape: f32[1,128], index: 7, kind: input, shape index: {}]   ;;  %s1289_s8 = inlined_call_operand.hbm [shape: f32[8,128], index: 8, kind: output, shape index: {}]  }
   0x1   :  { %14 = vsyncpa [#allocation6], 0 }
   0x2   :  { %15 = vsyncpa [#allocation9], 0  ;;  %s33_s29 = sshll.u32 %s1282_s1, 4  ;;  %s34_s29 = int_to_ptr.hbm [resolvable:$true] %s33_s29 }
   0x3   :  { %16 = vsyncpa [#allocation4], 0  ;;  %s1097_s30 = smov [#allocation5]   ;;  %s58_s12 = sshll.u32 %s1285_s4, 4  ;;  %s59_s12 = int_to_ptr.hbm [resolvable:$true] %s58_s12 }
   0x4   :  { %s35_s9 = sshll.u32 %s1097_s30, 4  ;;  %s1098_s13 = smov [#allocation8]   ;;  %s36_s9 = int_to_ptr.vmem [resolvable:$true] %s35_s9 }
   0x5   :  { %38 = dma.hbm_to_vmem [thread:$0]  %s34_s29, 16, %s36_s9, [#allocation6]  }
   0x6   :  { %s60_s14 = sshll.u32 %s1098_s13, 4  ;;  %s22_s17 = sshll.u32 %s1281_s0, 4  ;;  %s61_s14 = int_to_ptr.vmem [resolvable:$true] %s60_s14  ;;  %s23_s17 = int_to_ptr.hbm [resolvable:$true] %s22_s17 }
   0x7   :  { %s1099_s1 = smov 64   ;;  %s1100_s18 = smov 4  }
   0x8   :  { %66 = dma.hbm_to_vmem [thread:$0]  %s59_s12, 256, %s61_s14, [#allocation9], %s1099_s1, %s1099_s1, %s1100_s18  }
   0x9   :  { %s45_s21 = sshll.u32 %s1284_s3, 4  ;;  %s1101_s22 = smov [#allocation2]   ;;  %s46_s21 = int_to_ptr.hbm [resolvable:$true] %s45_s21 }
   0xa   :  { %s24_s4 = sshll.u32 %s1101_s22, 4  ;;  %s1102_s23 = smov [#allocation7]   ;;  %s25_s4 = int_to_ptr.vmem [resolvable:$true] %s24_s4 }
   0xb   :  { %27 = dma.hbm_to_vmem [thread:$0]  %s23_s17, 128, %s25_s4, [#allocation3]  }
   0xc   :  { %s47_s24 = sshll.u32 %s1102_s23, 4  ;;  %s73_s26 = sshll.u32 %s1287_s6, 4  ;;  %s48_s24 = int_to_ptr.vmem [resolvable:$true] %s47_s24  ;;  %s74_s26 = int_to_ptr.hbm [resolvable:$true] %s73_s26 }
   0xd   :  { %53 = dma.hbm_to_vmem [thread:$0]  %s46_s21, 2048, %s48_s24, [#allocation6], %s1099_s1, %s1099_s1, %s1100_s18  }
   0xe   :  { %s1103_s27 = smov [#allocation10]  }
   0xf   :  { %s75_s28 = sshll.u32 %s1103_s27, 4  ;;  %s76_s28 = int_to_ptr.vmem [resolvable:$true] %s75_s28 }
  0x10   :  { %81 = dma.hbm_to_vmem [thread:$0]  %s74_s26, 256, %s76_s28, [#allocation9], %s1099_s1, %s1099_s1, %s1100_s18  }
  0x11   :  { %1089 = dma.done.wait [#allocation3], 128  }
  0x12   :  { %1090 = vsyncadd [#allocation3], 4294967168 }
  0x13   :  { %1091 = dma.done.wait [#allocation6], 2064  }
  0x14   :  { %1092 = vsyncadd [#allocation6], 4294965232 }
  0x15   :  { %1093 = dma.done.wait [#allocation9], 512  }
  0x16   :  { %1094 = vsyncadd [#allocation9], 4294966784  ;;  %v872_v0 = vld [vmem:[#allocation7 + $0x38] sm:$0xff]  ;;  %v871_v2 = vld [vmem:[#allocation7 + $0x30] sm:$0xff]  ;;  %vm295_vm0 = vcmask 261120   ;;  %v271_v33 = vlaneseq  ;;  %s1104_s30 = smov 32  }
  0x17   :  { %v880_v1 = vld [vmem:[#allocation7 + $0x78] sm:$0xff]  ;;  %245 = vmatpush.bf16.msra.mxu0 %v872_v0  ;;  %v879_v3 = vld [vmem:[#allocation7 + $0x70] sm:$0xff]  ;;  %v1172_v4 = vld [vmem:[#allocation8 + $0x8] sm:$0xff]  ;;  %vm702_vm4 = vcmask 1040384   ;;  %vm704_vm5 = vcmask 1041408   ;;  %vm706_vm6 = vcmask 1042432  }
  0x18   :  { %258 = vmatpush.bf16.msra.mxu1 %v880_v1  ;;  %305 = vmatpush.bf16.msra.mxu2 %v1172_v4  ;;  %v1175_v5 = vld [vmem:[#allocation8] sm:$0xff]  ;;  %v276_v6 = vld [vmem:[#allocation5] sm:$0x1]  ;;  %v870_v7 = vld [vmem:[#allocation7 + $0x28] sm:$0xff]  ;;  %v272_v37 = vand.u32 127, %v271_v33  ;;  %vm708_vm7 = vcmask 1043456  }
  0x19   :  { %354 = vmatpush.bf16.msra.mxu3 %v1172_v4  ;;  %v878_v8 = vld [vmem:[#allocation7 + $0x68] sm:$0xff]  ;;  %v278_v9 = vpack.c.bf16 %v276_v6, %v276_v6  ;;  %v869_v10 = vld [vmem:[#allocation7 + $0x20] sm:$0xff]  ;;  %v868_v12 = vld [vmem:[#allocation7 + $0x18] sm:$0xff]  ;;  %vm710_vm8 = vcmask 1044480   ;;  %vm712_vm9 = vcmask 1045504   ;;  %vm714_vm10 = vcmask 1046528  }
  0x1a   :  { %v877_v11 = vld [vmem:[#allocation7 + $0x60] sm:$0xff]  ;;  %v876_v13 = vld [vmem:[#allocation7 + $0x58] sm:$0xff]  ;;  %v867_v14 = vld [vmem:[#allocation7 + $0x10] sm:$0xff]  ;;  %vm273_vm1 = vcmp.ge.s32.totalorder %v272_v37, 64  ;;  %vm274_vm2 = vcmp.lt.s32.totalorder %v272_v37, 96  ;;  %s1105_s10 = smov [#allocation11]  }
  0x1b   :  { %246 = vmatpush.bf16.msra.mxu0 %v871_v2  ;;  %v875_v15 = vld [vmem:[#allocation7 + $0x50] sm:$0xff]  ;;  %v866_v16 = vld [vmem:[#allocation7 + $0x8] sm:$0xff]  ;;  %v865_v21 = vld [vmem:[#allocation7] sm:$0xff]  ;;  %s762_s11 = sshll.u32 %s1105_s10, 4  ;;  %s764_s14 = sshll.u32 %s1289_s8, 4  ;;  %s763_s11 = int_to_ptr.vmem [resolvable:$true] %s762_s11  ;;  %s765_s14 = int_to_ptr.hbm [resolvable:$true] %s764_s14 }
  0x1c   :  { %259 = vmatpush.bf16.msra.mxu1 %v879_v3  ;;  %306 = vmatpush.bf16.msra.mxu2 %v1175_v5  ;;  %v874_v17 = vld [vmem:[#allocation7 + $0x48] sm:$0xff]  ;;  %v105_v18 = vld [vmem:[#allocation2] sm:$0xff]  ;;  %v873_v22 = vld [vmem:[#allocation7 + $0x40] sm:$0xff] }
  0x1d   :  { %355 = vmatpush.bf16.msra.mxu3 %v1175_v5  ;;  %v143_v19 = vunpack.c.l.b16 %v105_v18  ;;  %v144_v20 = vunpack.c.h.b16 %v105_v18  ;;  %v894_v27 = vld [vmem:[%s1286_s5] ss:$0 sm:$0xff]  ;;  %vm1197_vm3 = vmand %vm273_vm1, %vm274_vm2 }
  0x1e   :  { %v895_v44 = vld [vmem:[%s1283_s2] ss:$0 sm:$0xff] }
  0x1f   :  { %247 = vmatpush.bf16.msra.mxu0 %v870_v7  ;;  %848 = vmatmul.msk.bf16.vlgmr.msra.gmra.mxu2 %vm295_vm0, %v278_v9  ;;  %v145_v23 = vpack.c.b16 %v143_v19, %v143_v19  ;;  %v146_v24 = vpack.c.b16 %v144_v20, %v144_v20 }
  0x20   :  { %406 = vmatpush.bf16.msrb.mxu2 %v1172_v4  ;;  %260 = vmatpush.bf16.msra.mxu1 %v878_v8 }
  0x21   :  { %457 = vmatpush.bf16.msrb.mxu3 %v1172_v4 }
  0x23   :  { %248 = vmatpush.bf16.msra.mxu0 %v869_v10 }
  0x24   :  { %407 = vmatpush.bf16.msrb.mxu2 %v1175_v5  ;;  %261 = vmatpush.bf16.msra.mxu1 %v877_v11 }
  0x25   :  { %458 = vmatpush.bf16.msrb.mxu3 %v1175_v5 }
  0x27   :  { %249 = vmatpush.bf16.msra.mxu0 %v868_v12 }
  0x28   :  { %510 = vmatpush.bf16.msra.mxu2 %v1172_v4  ;;  %262 = vmatpush.bf16.msra.mxu1 %v876_v13 }
  0x2b   :  { %250 = vmatpush.bf16.msra.mxu0 %v867_v14 }
  0x2c   :  { %511 = vmatpush.bf16.msra.mxu2 %v1175_v5  ;;  %263 = vmatpush.bf16.msra.mxu1 %v875_v15 }
  0x2f   :  { %251 = vmatpush.bf16.msra.mxu0 %v866_v16 }
  0x30   :  { %264 = vmatpush.bf16.msra.mxu1 %v874_v17 }
  0x33   :  { %252 = vmatpush.bf16.msra.mxu0 %v865_v21 }
  0x34   :  { %265 = vmatpush.bf16.msra.mxu1 %v873_v22 }
  0x36   :  { %253 = vmatmul.bf16.vlgmr.msra.gmra.mxu0 %v145_v23 }
  0x37   :  { %614 = vmatpush.bf16.msrb.mxu0 %v1172_v4  ;;  %266 = vmatmul.bf16.vlgmr.msra.gmra.mxu1 %v146_v24 }
  0x38   :  { %665 = vmatpush.bf16.msrb.mxu1 %v1172_v4 }
  0x3b   :  { %615 = vmatpush.bf16.msrb.mxu0 %v1175_v5 }
  0x3c   :  { %666 = vmatpush.bf16.msrb.mxu1 %v1175_v5 }
  0xa2   :  { %v308_v25 = vpop.f32.mrf.mxu2 }
  0xaa   :  { %v310_v26 = vpop.f32.mrf.mxu2 }
  0xb3   :  { %v254_v28 = vpop.f32.mrf.mxu0 }
  0xb4   :  { %v267_v29 = vpop.f32.mrf.mxu1  ;;  %v255_v30 = vadd.f32 %v894_v27, %v254_v28 }
  0xb6   :  { %v1194_v31 = vadd.f32 %v267_v29, %v255_v30 }
  0xb8   :  { %v312_v32 = vadd.f32 %v308_v25, %v1194_v31 }
  0xba   :  { %v313_v34 = vmul.f32 0.5, %v312_v32 }
  0xbb   :  { %v256_v35 = vpop.f32.mrf.mxu0 }
  0xbc   :  { %v269_v36 = vpop.f32.mrf.mxu1  ;;  %897 = vtanh.f32 %v313_v34 }
  0xbd   :  { %899 = vtanh.f32 %v312_v32 }
  0xc2   :  { %v898_v38 = vpop.eup %897 }
  0xc3   :  { %v315_v39 = vmul.f32 0.5, %v898_v38  ;;  %v900_v42 = vpop.eup %899 }
  0xc5   :  { %v316_v41 = vadd.f32 0.5, %v315_v39 }
  0xc7   :  { %v318_v43 = vsel %vm1197_vm3, %v900_v42, %v316_v41 }
  0xc8   :  { %326 = vrot.lane.b32.xlu0 %v318_v43, %s1099_s1 }
  0xd0   :  { %321 = vrot.lane.b32.xlu0 %v895_v44, %s1104_s30 }
 0x13a   :  { %v327_v45 = vpop.permute.xlu0 %326 }
 0x13b   :  { %v329_v46 = vmul.f32 %v327_v45, %v318_v43 }
 0x13d   :  { %331 = vrot.lane.b32.xlu1 %v329_v46, %s1104_s30 }
 0x142   :  { %v322_v47 = vpop.permute.xlu0 %321 }
 0x143   :  { %v324_v48 = vmul.f32 %v322_v47, %v318_v43 }
 0x1af   :  { %v332_v49 = vpop.permute.xlu1 %331 }
 0x1b0   :  { %v334_v50 = vadd.f32 %v332_v49, %v324_v48 }
 0x1b2   :  { %901 = vtanh.f32 %v334_v50 }
 0x1b8   :  { %v902_v51 = vpop.eup %901 }
 0x1b9   :  { %337 = vrot.lane.b32.xlu1 %v902_v51, %s1099_s1 }
 0x22b   :  { %v338_v52 = vpop.permute.xlu1 %337 }
 0x22c   :  { %v1210_v53 = vmul.f32 %v338_v52, %v318_v43 }
 0x22e   :  { %v341_v54 = vpack.c.bf16 %v1210_v53, %v1210_v53 }
 0x230   :  { %343 = vrot.lane.b32.xlu2 %v341_v54, %s1104_s30 }
 0x28a   :  { %v344_v55 = vpop.permute.xlu2 %343 }
 0x28b   :  { %849 = vmatmul.msk.bf16.vlgmr.msra.gmra.mxu3 %vm295_vm0, %v344_v55 }
 0x28c   :  { %561 = vmatpush.bf16.msra.mxu3 %v1172_v4  ;;  %v372_v4 = vrot.slane %v334_v50, 7 }
 0x290   :  { %562 = vmatpush.bf16.msra.mxu3 %v1175_v5 }
 0x30e   :  { %v357_v56 = vpop.f32.mrf.mxu3 }
 0x30f   :  { %v362_v57 = vrot.slane %v357_v56, 7 }
 0x311   :  { %v364_v58 = vadd.f32 %v362_v57, %v1194_v31 }
 0x313   :  { %v365_v59 = vmul.f32 0.5, %v364_v58 }
 0x315   :  { %903 = vtanh.f32 %v365_v59 }
 0x316   :  { %v359_v60 = vpop.f32.mrf.mxu3  ;;  %905 = vtanh.f32 %v364_v58 }
 0x31b   :  { %v904_v61 = vpop.eup %903 }
 0x31c   :  { %v367_v62 = vmul.f32 0.5, %v904_v61  ;;  %v906_v0 = vpop.eup %905 }
 0x31e   :  { %v368_v63 = vadd.f32 0.5, %v367_v62 }
 0x320   :  { %v370_v1 = vsel %vm1197_vm3, %v906_v0, %v368_v63 }
 0x321   :  { %376 = vrot.lane.b32.xlu2 %v370_v1, %s1099_s1  ;;  %v374_v5 = vmul.f32 %v372_v4, %v370_v1 }
 0x37b   :  { %v377_v2 = vpop.permute.xlu2 %376 }
 0x37c   :  { %v379_v3 = vmul.f32 %v377_v2, %v370_v1 }
 0x37e   :  { %381 = vrot.lane.b32.xlu0 %v379_v3, %s1104_s30 }
 0x3f0   :  { %v382_v6 = vpop.permute.xlu0 %381 }
 0x3f1   :  { %v384_v7 = vadd.f32 %v382_v6, %v374_v5 }
 0x3f3   :  { %907 = vtanh.f32 %v384_v7  ;;  %v424_v26 = vrot.slane %v384_v7, 7 }
 0x3f9   :  { %v908_v8 = vpop.eup %907 }
 0x3fa   :  { %387 = vrot.lane.b32.xlu1 %v908_v8, %s1099_s1 }
 0x46c   :  { %v388_v9 = vpop.permute.xlu1 %387 }
 0x46d   :  { %v390_v10 = vmul.f32 %v388_v9, %v370_v1 }
 0x46f   :  { %v391_v11 = vpack.c.bf16 %v390_v10, %v390_v10  ;;  %v703_v34 = vsel %vm702_vm4, %v1210_v53, %v390_v10 }
 0x471   :  { %v393_v12 = vshrl.u32 %v391_v11, 16 }
 0x473   :  { %395 = vrot.lane.b32.xlu2 %v393_v12, %s1104_s30 }
 0x4cd   :  { %v396_v13 = vpop.permute.xlu2 %395 }
 0x4ce   :  { %850 = vmatmul.msk.bf16.vlgmr.msrb.gmra.mxu2 %vm295_vm0, %v396_v13 }
 0x551   :  { %v409_v14 = vpop.f32.mrf.mxu2 }
 0x552   :  { %v414_v15 = vrot.slane %v409_v14, 6 }
 0x554   :  { %v416_v16 = vadd.f32 %v414_v15, %v1194_v31 }
 0x556   :  { %v417_v17 = vmul.f32 0.5, %v416_v16 }
 0x558   :  { %909 = vtanh.f32 %v417_v17 }
 0x559   :  { %v411_v18 = vpop.f32.mrf.mxu2  ;;  %911 = vtanh.f32 %v416_v16 }
 0x55e   :  { %v910_v19 = vpop.eup %909 }
 0x55f   :  { %v419_v20 = vmul.f32 0.5, %v910_v19  ;;  %v912_v22 = vpop.eup %911 }
 0x561   :  { %v420_v21 = vadd.f32 0.5, %v419_v20 }
 0x563   :  { %v422_v23 = vsel %vm1197_vm3, %v912_v22, %v420_v21 }
 0x564   :  { %428 = vrot.lane.b32.xlu0 %v422_v23, %s1099_s1  ;;  %v426_v27 = vmul.f32 %v424_v26, %v422_v23 }
 0x5d6   :  { %v429_v24 = vpop.permute.xlu0 %428 }
 0x5d7   :  { %v431_v25 = vmul.f32 %v429_v24, %v422_v23 }
 0x5d9   :  { %433 = vrot.lane.b32.xlu1 %v431_v25, %s1104_s30 }
 0x64b   :  { %v434_v28 = vpop.permute.xlu1 %433 }
 0x64c   :  { %v436_v29 = vadd.f32 %v434_v28, %v426_v27 }
 0x64e   :  { %913 = vtanh.f32 %v436_v29  ;;  %v475_v52 = vrot.slane %v436_v29, 7 }
 0x654   :  { %v914_v30 = vpop.eup %913 }
 0x655   :  { %439 = vrot.lane.b32.xlu2 %v914_v30, %s1099_s1 }
 0x6af   :  { %v440_v32 = vpop.permute.xlu2 %439 }
 0x6b0   :  { %v442_v33 = vmul.f32 %v440_v32, %v422_v23 }
 0x6b2   :  { %v443_v35 = vpack.c.bf16 %v442_v33, %v442_v33  ;;  %v705_v36 = vsel %vm704_vm5, %v703_v34, %v442_v33 }
 0x6b4   :  { %v445_v37 = vrot.slane %v443_v35, 1 }
 0x6b6   :  { %446 = vrot.lane.b32.xlu0 %v445_v37, %s1104_s30 }
 0x728   :  { %v447_v38 = vpop.permute.xlu0 %446 }
 0x729   :  { %851 = vmatmul.msk.bf16.vlgmr.msrb.gmra.mxu3 %vm295_vm0, %v447_v38 }
 0x7ac   :  { %v460_v39 = vpop.f32.mrf.mxu3 }
 0x7ad   :  { %v465_v41 = vrot.slane %v460_v39, 5 }
 0x7af   :  { %v467_v42 = vadd.f32 %v465_v41, %v1194_v31 }
 0x7b1   :  { %v468_v43 = vmul.f32 0.5, %v467_v42 }
 0x7b3   :  { %915 = vtanh.f32 %v468_v43 }
 0x7b4   :  { %v462_v44 = vpop.f32.mrf.mxu3  ;;  %917 = vtanh.f32 %v467_v42 }
 0x7b9   :  { %v916_v45 = vpop.eup %915 }
 0x7ba   :  { %v470_v46 = vmul.f32 0.5, %v916_v45  ;;  %v918_v48 = vpop.eup %917 }
 0x7bc   :  { %v471_v47 = vadd.f32 0.5, %v470_v46 }
 0x7be   :  { %v473_v49 = vsel %vm1197_vm3, %v918_v48, %v471_v47 }
 0x7bf   :  { %479 = vrot.lane.b32.xlu1 %v473_v49, %s1099_s1  ;;  %v477_v53 = vmul.f32 %v475_v52, %v473_v49 }
 0x831   :  { %v480_v50 = vpop.permute.xlu1 %479 }
 0x832   :  { %v482_v51 = vmul.f32 %v480_v50, %v473_v49 }
 0x834   :  { %484 = vrot.lane.b32.xlu2 %v482_v51, %s1104_s30 }
 0x88e   :  { %v485_v54 = vpop.permute.xlu2 %484 }
 0x88f   :  { %v487_v55 = vadd.f32 %v485_v54, %v477_v53 }
 0x891   :  { %919 = vtanh.f32 %v487_v55  ;;  %v528_v12 = vrot.slane %v487_v55, 7 }
 0x897   :  { %v920_v56 = vpop.eup %919 }
 0x898   :  { %490 = vrot.lane.b32.xlu0 %v920_v56, %s1099_s1 }
 0x90a   :  { %v491_v57 = vpop.permute.xlu0 %490 }
 0x90b   :  { %v493_v58 = vmul.f32 %v491_v57, %v473_v49 }
 0x90d   :  { %v494_v59 = vpack.c.bf16 %v493_v58, %v493_v58  ;;  %v707_v60 = vsel %vm706_vm6, %v705_v36, %v493_v58 }
 0x90f   :  { %v496_v61 = vshrl.u32 %v494_v59, 16 }
 0x911   :  { %v498_v62 = vrot.slane %v496_v61, 1 }
 0x913   :  { %499 = vrot.lane.b32.xlu1 %v498_v62, %s1104_s30 }
 0x985   :  { %v500_v63 = vpop.permute.xlu1 %499 }
 0x986   :  { %852 = vmatmul.msk.bf16.vlgmr.msra.gmra.mxu2 %vm295_vm0, %v500_v63 }
 0xa09   :  { %v513_v0 = vpop.f32.mrf.mxu2 }
 0xa0a   :  { %v518_v1 = vrot.slane %v513_v0, 4 }
 0xa0c   :  { %v520_v2 = vadd.f32 %v518_v1, %v1194_v31 }
 0xa0e   :  { %v521_v3 = vmul.f32 0.5, %v520_v2 }
 0xa10   :  { %921 = vtanh.f32 %v521_v3 }
 0xa11   :  { %v515_v4 = vpop.f32.mrf.mxu2  ;;  %923 = vtanh.f32 %v520_v2 }
 0xa16   :  { %v922_v5 = vpop.eup %921 }
 0xa17   :  { %v523_v6 = vmul.f32 0.5, %v922_v5  ;;  %v924_v8 = vpop.eup %923 }
 0xa19   :  { %v524_v7 = vadd.f32 0.5, %v523_v6 }
 0xa1b   :  { %v526_v9 = vsel %vm1197_vm3, %v924_v8, %v524_v7 }
 0xa1c   :  { %532 = vrot.lane.b32.xlu2 %v526_v9, %s1099_s1  ;;  %v530_v13 = vmul.f32 %v528_v12, %v526_v9 }
 0xa76   :  { %v533_v10 = vpop.permute.xlu2 %532 }
 0xa77   :  { %v535_v11 = vmul.f32 %v533_v10, %v526_v9 }
 0xa79   :  { %537 = vrot.lane.b32.xlu0 %v535_v11, %s1104_s30 }
 0xaeb   :  { %v538_v14 = vpop.permute.xlu0 %537 }
 0xaec   :  { %v540_v15 = vadd.f32 %v538_v14, %v530_v13 }
 0xaee   :  { %925 = vtanh.f32 %v540_v15  ;;  %v579_v36 = vrot.slane %v540_v15, 7 }
 0xaf4   :  { %v926_v16 = vpop.eup %925 }
 0xaf5   :  { %543 = vrot.lane.b32.xlu1 %v926_v16, %s1099_s1 }
 0xb67   :  { %v544_v17 = vpop.permute.xlu1 %543 }
 0xb68   :  { %v546_v18 = vmul.f32 %v544_v17, %v526_v9 }
 0xb6a   :  { %v547_v19 = vpack.c.bf16 %v546_v18, %v546_v18  ;;  %v709_v20 = vsel %vm708_vm7, %v707_v60, %v546_v18 }
 0xb6c   :  { %v549_v21 = vrot.slane %v547_v19, 2 }
 0xb6e   :  { %550 = vrot.lane.b32.xlu2 %v549_v21, %s1104_s30 }
 0xbc8   :  { %v551_v22 = vpop.permute.xlu2 %550 }
 0xbc9   :  { %853 = vmatmul.msk.bf16.vlgmr.msra.gmra.mxu3 %vm295_vm0, %v551_v22 }
 0xc4c   :  { %v564_v23 = vpop.f32.mrf.mxu3 }
 0xc4d   :  { %v569_v24 = vrot.slane %v564_v23, 3 }
 0xc4f   :  { %v571_v25 = vadd.f32 %v569_v24, %v1194_v31  ;;  %v884_v24 = vld [vmem:[#allocation10 + $0x8] sm:$0xff] }
 0xc50   :  { %749 = vmatpush.bf16.msrb.mxu2 %v884_v24 }
 0xc51   :  { %v572_v26 = vmul.f32 0.5, %v571_v25 }
 0xc53   :  { %927 = vtanh.f32 %v572_v26 }
 0xc54   :  { %v566_v27 = vpop.f32.mrf.mxu3  ;;  %929 = vtanh.f32 %v571_v25  ;;  %v883_v25 = vld [vmem:[#allocation10] sm:$0xff] }
 0xc55   :  { %750 = vmatpush.bf16.msrb.mxu2 %v883_v25 }
 0xc59   :  { %v928_v28 = vpop.eup %927 }
 0xc5a   :  { %v574_v29 = vmul.f32 0.5, %v928_v28  ;;  %v930_v32 = vpop.eup %929 }
 0xc5c   :  { %v575_v30 = vadd.f32 0.5, %v574_v29 }
 0xc5e   :  { %v577_v33 = vsel %vm1197_vm3, %v930_v32, %v575_v30  ;;  %v896_v30 = vld [vmem:[%s1288_s7] ss:$0 sm:$0xff] }
 0xc5f   :  { %583 = vrot.lane.b32.xlu0 %v577_v33, %s1099_s1  ;;  %v581_v37 = vmul.f32 %v579_v36, %v577_v33 }
 0xcd1   :  { %v584_v34 = vpop.permute.xlu0 %583 }
 0xcd2   :  { %v586_v35 = vmul.f32 %v584_v34, %v577_v33 }
 0xcd4   :  { %588 = vrot.lane.b32.xlu1 %v586_v35, %s1104_s30 }
 0xd46   :  { %v589_v38 = vpop.permute.xlu1 %588 }
 0xd47   :  { %v591_v39 = vadd.f32 %v589_v38, %v581_v37 }
 0xd49   :  { %931 = vtanh.f32 %v591_v39  ;;  %v632_v61 = vrot.slane %v591_v39, 7 }
 0xd4f   :  { %v932_v41 = vpop.eup %931 }
 0xd50   :  { %594 = vrot.lane.b32.xlu2 %v932_v41, %s1099_s1 }
 0xdaa   :  { %v595_v42 = vpop.permute.xlu2 %594 }
 0xdab   :  { %v597_v43 = vmul.f32 %v595_v42, %v577_v33 }
 0xdad   :  { %v598_v44 = vpack.c.bf16 %v597_v43, %v597_v43  ;;  %v711_v45 = vsel %vm710_vm8, %v709_v20, %v597_v43 }
 0xdaf   :  { %v600_v46 = vshrl.u32 %v598_v44, 16 }
 0xdb1   :  { %v602_v47 = vrot.slane %v600_v46, 2 }
 0xdb3   :  { %603 = vrot.lane.b32.xlu0 %v602_v47, %s1104_s30 }
 0xe25   :  { %v604_v48 = vpop.permute.xlu0 %603 }
 0xe26   :  { %854 = vmatmul.msk.bf16.vlgmr.msrb.gmra.mxu0 %vm295_vm0, %v604_v48 }
 0xea3   :  { %v617_v49 = vpop.f32.mrf.mxu0 }
 0xea4   :  { %v622_v50 = vrot.slane %v617_v49, 2 }
 0xea6   :  { %v624_v51 = vadd.f32 %v622_v50, %v1194_v31 }
 0xea8   :  { %v625_v52 = vmul.f32 0.5, %v624_v51 }
 0xeaa   :  { %933 = vtanh.f32 %v625_v52 }
 0xeab   :  { %v619_v53 = vpop.f32.mrf.mxu0  ;;  %935 = vtanh.f32 %v624_v51 }
 0xeb0   :  { %v934_v54 = vpop.eup %933 }
 0xeb1   :  { %v627_v55 = vmul.f32 0.5, %v934_v54  ;;  %v936_v57 = vpop.eup %935 }
 0xeb3   :  { %v628_v56 = vadd.f32 0.5, %v627_v55 }
 0xeb5   :  { %v630_v58 = vsel %vm1197_vm3, %v936_v57, %v628_v56 }
 0xeb6   :  { %636 = vrot.lane.b32.xlu1 %v630_v58, %s1099_s1  ;;  %v634_v62 = vmul.f32 %v632_v61, %v630_v58 }
 0xf28   :  { %v637_v59 = vpop.permute.xlu1 %636 }
 0xf29   :  { %v639_v60 = vmul.f32 %v637_v59, %v630_v58 }
 0xf2b   :  { %641 = vrot.lane.b32.xlu2 %v639_v60, %s1104_s30 }
 0xf85   :  { %v642_v63 = vpop.permute.xlu2 %641 }
 0xf86   :  { %v644_v0 = vadd.f32 %v642_v63, %v634_v62 }
 0xf88   :  { %937 = vtanh.f32 %v644_v0  ;;  %v683_v20 = vrot.slane %v644_v0, 7 }
 0xf8e   :  { %v938_v1 = vpop.eup %937 }
 0xf8f   :  { %647 = vrot.lane.b32.xlu0 %v938_v1, %s1099_s1 }
0x1001   :  { %v648_v2 = vpop.permute.xlu0 %647 }
0x1002   :  { %v650_v3 = vmul.f32 %v648_v2, %v630_v58 }
0x1004   :  { %v651_v4 = vpack.c.bf16 %v650_v3, %v650_v3  ;;  %v713_v5 = vsel %vm712_vm9, %v711_v45, %v650_v3 }
0x1006   :  { %v653_v6 = vrot.slane %v651_v4, 3 }
0x1008   :  { %654 = vrot.lane.b32.xlu1 %v653_v6, %s1104_s30 }
0x107a   :  { %v655_v7 = vpop.permute.xlu1 %654 }
0x107b   :  { %855 = vmatmul.msk.bf16.vlgmr.msrb.gmra.mxu1 %vm295_vm0, %v655_v7 }
0x10f8   :  { %v668_v8 = vpop.f32.mrf.mxu1 }
0x10f9   :  { %v673_v9 = vrot.slane %v668_v8, 1 }
0x10fb   :  { %v675_v10 = vadd.f32 %v673_v9, %v1194_v31 }
0x10fd   :  { %v676_v11 = vmul.f32 0.5, %v675_v10 }
0x10ff   :  { %939 = vtanh.f32 %v676_v11 }
0x1100   :  { %v670_v12 = vpop.f32.mrf.mxu1  ;;  %941 = vtanh.f32 %v675_v10 }
0x1105   :  { %v940_v13 = vpop.eup %939 }
0x1106   :  { %v678_v14 = vmul.f32 0.5, %v940_v13  ;;  %v942_v16 = vpop.eup %941 }
0x1108   :  { %v679_v15 = vadd.f32 0.5, %v678_v14 }
0x110a   :  { %v681_v17 = vsel %vm1197_vm3, %v942_v16, %v679_v15 }
0x110b   :  { %687 = vrot.lane.b32.xlu2 %v681_v17, %s1099_s1  ;;  %v685_v21 = vmul.f32 %v683_v20, %v681_v17 }
0x1165   :  { %v688_v18 = vpop.permute.xlu2 %687 }
0x1166   :  { %v690_v19 = vmul.f32 %v688_v18, %v681_v17 }
0x1168   :  { %692 = vrot.lane.b32.xlu0 %v690_v19, %s1104_s30 }
0x11da   :  { %v693_v31 = vpop.permute.xlu0 %692 }
0x11db   :  { %v695_v22 = vadd.f32 %v693_v31, %v685_v21 }
0x11dd   :  { %943 = vtanh.f32 %v695_v22 }
0x11e3   :  { %v944_v23 = vpop.eup %943 }
0x11e4   :  { %698 = vrot.lane.b32.xlu1 %v944_v23, %s1099_s1 }
0x1256   :  { %v699_v40 = vpop.permute.xlu1 %698 }
0x1257   :  { %v701_v26 = vmul.f32 %v699_v40, %v681_v17 }
0x1259   :  { %v715_v27 = vsel %vm714_vm10, %v713_v5, %v701_v26 }
0x125a   :  { %v716_v28 = vpack.c.bf16 %v715_v27, %v715_v27 }
0x125c   :  { %726 = vrot.lane.b32.xlu2 %v716_v28, %s1104_s30 }
0x12b6   :  { %v727_v29 = vpop.permute.xlu2 %726 }
0x12b7   :  { %864 = vmatmul.msk.bf16.vlgmr.msrb.gmra.mxu2 %vm295_vm0, %v727_v29 }
0x133a   :  { %v752_v32 = vpop.f32.mrf.mxu2 }
0x133b   :  { %v753_v33 = vadd.f32 %v896_v30, %v752_v32 }
0x133d   :  { %756 = vst [vmem:[#allocation11] sm:$0xff] %v753_v33 }
0x133e   :  { %767 = dma.vmem_to_hbm [thread:$0]  %s763_s11, 128, %s765_s14, [#allocation4]  }
0x1342   :  { %v754_v34 = vpop.f32.mrf.mxu2 }
0x1343   :  { %1095 = dma.done.wait [#allocation4], 128  }
0x1344   :  { %1096 = vsyncadd [#allocation4], 4294967168 }
0x1345   :  { %772 = vsyncpa [#allocation3], 1 }
0x1346   :  { %773 = vsyncpa [#allocation6], 1 }
0x1347   :  { %774 = vsyncpa [#allocation9], 1 }
0x1348   :  { %775 = vsyncpa [#allocation4], 1 }

</bundles_post_ra>
